<compile_context>
chip_gen: v6e
topology: v6e:2x2x1
jax: 0.10.0
libtpu: 0.0.40
codegen_flags: <defaults>
</compile_context>

<pallas_src>
import functools

import jax
import jax.numpy as jnp
from jax.experimental import pallas as pl
from jax.experimental.pallas import tpu as pltpu

# Module hyper-parameters (AssymetricLoss.__init__ defaults).
GAMMA_NEG = 4.0
GAMMA_POS = 1.0
CLIP = 0.05
EPS = 1e-8

# (block_rows, 128) f32 tile = 1 MiB per input block -> ~4 MiB with double
# buffering of both inputs: comfortably inside the scoped-VMEM default on
# v5e (16 MiB), v6e (32 MiB) and v7x (32 MiB / 64 MiB physical).
DEFAULT_BLOCK_ROWS = 2048


def _asl_kernel(x_ref, y_ref, out_ref, *, total, block_rows):
    i = pl.program_id(0)

    x = x_ref[...].astype(jnp.float32)
    y = y_ref[...].astype(jnp.float32)

    # sigmoid / shifted complementary probability (clip on negative side)
    xs_pos = jax.nn.sigmoid(x)
    xs_neg = jnp.minimum((1.0 - xs_pos) + CLIP, 1.0)

    # base cross-entropy terms
    one_m_y = 1.0 - y
    los_pos = y * jnp.log(jnp.maximum(xs_pos, EPS))
    los_neg = one_m_y * jnp.log(jnp.maximum(xs_neg, EPS))
    loss = los_pos + los_neg

    # asymmetric focusing weight.
    # pt = xs_pos*y + xs_neg*(1-y), written with one fewer multiply.
    pt = xs_neg + y * (xs_pos - xs_neg)
    t = 1.0 - pt
    # gamma_pos = 1, gamma_neg = 4 and y is a hard {0,1} label, so
    # (1-pt)^gamma is either t or t^4: two VPU squarings + select, no EUP pow.
    # TODO(synk): if soft labels are ever used, fall back to
    #             jnp.power(t, GAMMA_POS*y + GAMMA_NEG*(1-y)).
    t2 = t * t
    w = jnp.where(y > 0.5, t, t2 * t2)
    loss = loss * w

    # mask out the zero-padded tail introduced by flattening/tiling
    row_ids = jax.lax.broadcasted_iota(jnp.int32, (block_rows, 128), 0)
    col_ids = jax.lax.broadcasted_iota(jnp.int32, (block_rows, 128), 1)
    elem_idx = (i * block_rows + row_ids) * 128 + col_ids
    loss = jnp.where(elem_idx < total, loss, 0.0)

    # per-tile partial sum, kept as a sublane/lane-dense (8, 128) slab
    partial = loss.reshape(block_rows // 8, 8, 128).sum(axis=0)
    out_ref[0, :, :] = partial


def assymetric_loss(x, y, *, block_rows=DEFAULT_BLOCK_ROWS):
    """x, y: (N, C, H, W) arrays (NCHW, like PyTorch). Returns scalar loss."""
    n = x.shape[0]
    total = int(x.size)

    # Flatten to a lane-dense (rows, 128) layout, padded to a whole number
    # of (block_rows, 128) tiles.
    rows_raw = -(-total // 128)                      # cdiv(total, 128)
    br = min(block_rows, ((rows_raw + 7) // 8) * 8)  # block rows, multiple of 8
    n_tiles = -(-rows_raw // br)
    rows = n_tiles * br
    pad = rows * 128 - total

    xf = x.reshape(-1)
    yf = y.reshape(-1)
    if pad:
        xf = jnp.pad(xf, (0, pad))
        yf = jnp.pad(yf, (0, pad))
    x2 = xf.reshape(rows, 128)   # keep native dtype; cast to f32 in-kernel
    y2 = yf.reshape(rows, 128)

    kernel = functools.partial(_asl_kernel, total=total, block_rows=br)
    partials = pl.pallas_call(
        kernel,
        out_shape=jax.ShapeDtypeStruct((n_tiles, 8, 128), jnp.float32),
        grid=(n_tiles,),
        in_specs=[
            pl.BlockSpec((br, 128), lambda i: (i, 0)),
            pl.BlockSpec((br, 128), lambda i: (i, 0)),
        ],
        out_specs=pl.BlockSpec((1, 8, 128), lambda i: (i, 0, 0)),
        compiler_params=pltpu.CompilerParams(
            dimension_semantics=("parallel",)),
    )(x2, y2)

    # tiny final reduction + (-1/N) scale in plain JAX
    return -(jnp.sum(partials) / jnp.float32(n))


def _reference(x, y):
    # Plain-JAX reference mirroring the PyTorch forward, for sanity checking.
    x = x.astype(jnp.float32)
    y = y.astype(jnp.float32)
    xs_pos = jax.nn.sigmoid(x)
    xs_neg = jnp.minimum(1.0 - xs_pos + CLIP, 1.0)
    los_pos = y * jnp.log(jnp.maximum(xs_pos, EPS))
    los_neg = (1.0 - y) * jnp.log(jnp.maximum(xs_neg, EPS))
    loss = los_pos + los_neg
    pt = xs_pos * y + xs_neg * (1.0 - y)
    gamma = GAMMA_POS * y + GAMMA_NEG * (1.0 - y)
    loss = loss * jnp.power(1.0 - pt, gamma)
    return -jnp.mean(jnp.sum(loss, axis=(1, 2, 3)))


if __name__ == "__main__":
    key = jax.random.PRNGKey(0)
    kx, ky = jax.random.split(key)
    # Small NCHW shapes consistent with a multi-label dense-prediction loss.
    x = jax.random.normal(kx, (2, 4, 16, 16), dtype=jnp.float32)
    y = jax.random.bernoulli(ky, p=0.3, shape=(2, 4, 16, 16)).astype(jnp.float32)

    loss = jax.block_until_ready(assymetric_loss(x, y))
    ref = jax.block_until_ready(_reference(x, y))

    assert jnp.isfinite(loss), "kernel produced non-finite loss"
    err = abs(float(loss) - float(ref))
    assert err <= 1e-3 + 1e-4 * abs(float(ref)), (float(loss), float(ref))
    print("KERNEL_OK")
</pallas_src>

<mosaic_0001>
module attributes {stable_mosaic.version = 11 : i64} {
  func.func @_asl_kernel(%arg0: i32, %arg1: memref<16x128xf32, #tpu.memory_space<vmem>>, %arg2: memref<16x128xf32, #tpu.memory_space<vmem>>, %arg3: memref<1x8x128xf32, #tpu.memory_space<vmem>>) attributes {dimension_semantics = [#tpu.dimension_semantics<parallel>], iteration_bounds = array<i64: 1>, scalar_prefetch = 0 : i64, scratch_operands = 0 : i64, tpu.core_type = #tpu.core_type<tc>, window_params = [{transform_indices = @transform_0, window_bounds = array<i64: 16, 128>}, {transform_indices = @transform_1, window_bounds = array<i64: 16, 128>}, {transform_indices = @transform_2, window_bounds = array<i64: 1, 8, 128>}]} {
    %c0 = arith.constant 0 : index
    %c0_0 = arith.constant 0 : index
    %0 = vector.load %arg1[%c0, %c0_0] : memref<16x128xf32, #tpu.memory_space<vmem>>, vector<16x128xf32>
    %c0_1 = arith.constant 0 : index
    %c0_2 = arith.constant 0 : index
    %1 = vector.load %arg2[%c0_1, %c0_2] : memref<16x128xf32, #tpu.memory_space<vmem>>, vector<16x128xf32>
    %2 = arith.negf %0 : vector<16x128xf32>
    %3 = math.exp %2 : vector<16x128xf32>
    %cst = arith.constant 1.000000e+00 : f32
    %4 = vector.broadcast %cst : f32 to vector<16x128xf32>
    %5 = arith.addf %4, %3 : vector<16x128xf32>
    %6 = arith.divf %4, %5 : vector<16x128xf32>
    %cst_3 = arith.constant 1.000000e+00 : f32
    %7 = vector.broadcast %cst_3 : f32 to vector<16x128xf32>
    %8 = arith.subf %7, %6 : vector<16x128xf32>
    %cst_4 = arith.constant 5.000000e-02 : f32
    %9 = vector.broadcast %cst_4 : f32 to vector<16x128xf32>
    %10 = arith.addf %8, %9 : vector<16x128xf32>
    %cst_5 = arith.constant 1.000000e+00 : f32
    %11 = vector.broadcast %cst_5 : f32 to vector<16x128xf32>
    %12 = arith.minimumf %10, %11 : vector<16x128xf32>
    %cst_6 = arith.constant 1.000000e+00 : f32
    %13 = vector.broadcast %cst_6 : f32 to vector<16x128xf32>
    %14 = arith.subf %13, %1 : vector<16x128xf32>
    %cst_7 = arith.constant 9.99999993E-9 : f32
    %15 = vector.broadcast %cst_7 : f32 to vector<16x128xf32>
    %16 = arith.maximumf %6, %15 : vector<16x128xf32>
    %17 = math.log %16 : vector<16x128xf32>
    %18 = arith.mulf %1, %17 : vector<16x128xf32>
    %cst_8 = arith.constant 9.99999993E-9 : f32
    %19 = vector.broadcast %cst_8 : f32 to vector<16x128xf32>
    %20 = arith.maximumf %12, %19 : vector<16x128xf32>
    %21 = math.log %20 : vector<16x128xf32>
    %22 = arith.mulf %14, %21 : vector<16x128xf32>
    %23 = arith.addf %18, %22 : vector<16x128xf32>
    %24 = arith.subf %6, %12 : vector<16x128xf32>
    %25 = arith.mulf %1, %24 : vector<16x128xf32>
    %26 = arith.addf %12, %25 : vector<16x128xf32>
    %cst_9 = arith.constant 1.000000e+00 : f32
    %27 = vector.broadcast %cst_9 : f32 to vector<16x128xf32>
    %28 = arith.subf %27, %26 : vector<16x128xf32>
    %29 = arith.mulf %28, %28 : vector<16x128xf32>
    %cst_10 = arith.constant 5.000000e-01 : f32
    %30 = vector.broadcast %cst_10 : f32 to vector<16x128xf32>
    %31 = arith.cmpf ogt, %1, %30 : vector<16x128xf32>
    %32 = arith.mulf %29, %29 : vector<16x128xf32>
    %33 = arith.select %31, %28, %32 : vector<16x128xi1>, vector<16x128xf32>
    %34 = arith.mulf %23, %33 : vector<16x128xf32>
    %35 = tpu.iota {dimensions = array<i32: 0>} : vector<16x128xi32>
    %36 = tpu.iota {dimensions = array<i32: 1>} : vector<16x128xi32>
    %c16_i32 = arith.constant 16 : i32
    %37 = arith.muli %arg0, %c16_i32 : i32
    %38 = vector.broadcast %37 : i32 to vector<16x128xi32>
    %39 = arith.addi %38, %35 : vector<16x128xi32>
    %c128_i32 = arith.constant 128 : i32
    %40 = vector.broadcast %c128_i32 : i32 to vector<16x128xi32>
    %41 = arith.muli %39, %40 : vector<16x128xi32>
    %42 = arith.addi %41, %36 : vector<16x128xi32>
    %c2048_i32 = arith.constant 2048 : i32
    %43 = vector.broadcast %c2048_i32 : i32 to vector<16x128xi32>
    %44 = arith.cmpi slt, %42, %43 : vector<16x128xi32>
    %cst_11 = arith.constant 0.000000e+00 : f32
    %45 = vector.broadcast %cst_11 : f32 to vector<16x128xf32>
    %46 = arith.select %44, %34, %45 : vector<16x128xi1>, vector<16x128xf32>
    %47 = vector.shape_cast %46 : vector<16x128xf32> to vector<2x8x128xf32>
    %cst_12 = arith.constant dense<0.000000e+00> : vector<8x128xf32>
    %48 = vector.multi_reduction <add>, %47, %cst_12 [0] : vector<2x8x128xf32> to vector<8x128xf32>
    %c0_13 = arith.constant 0 : index
    %c0_14 = arith.constant 0 : index
    %c0_15 = arith.constant 0 : index
    %49 = vector.load %arg3[%c0_13, %c0_14, %c0_15] : memref<1x8x128xf32, #tpu.memory_space<vmem>>, vector<1x8x128xf32>
    %50 = vector.shape_cast %49 : vector<1x8x128xf32> to vector<8x128xf32>
    %51 = vector.shape_cast %48 : vector<8x128xf32> to vector<1x8x128xf32>
    tpu.vector_store %arg3[%c0_13, %c0_14, %c0_15], %51 {strides = array<i32>} : memref<1x8x128xf32, #tpu.memory_space<vmem>>, vector<1x8x128xf32>,
    return
  }
  func.func @transform_0(%arg0: i32) -> (i32, i32) {
    %c0_i32 = arith.constant 0 : i32
    %c0_i32_0 = arith.constant 0 : i32
    return %arg0, %c0_i32 : i32, i32
  }
  func.func @transform_1(%arg0: i32) -> (i32, i32) {
    %c0_i32 = arith.constant 0 : i32
    %c0_i32_0 = arith.constant 0 : i32
    return %arg0, %c0_i32 : i32, i32
  }
  func.func @transform_2(%arg0: i32) -> (i32, i32, i32) {
    %c0_i32 = arith.constant 0 : i32
    %c0_i32_0 = arith.constant 0 : i32
    %c0_i32_1 = arith.constant 0 : i32
    return %arg0, %c0_i32, %c0_i32_0 : i32, i32, i32
  }
}

</mosaic_0001>

<bundles_post_ra>
// kernel: tpu_custom_call.1
= control target key start
LH: loop header
LB: loop body
LE: loop exit
PB: predicated region body
PF: predicated region fallthrough
CT: control target
= control target key end

     0   :  { %7 = vsyncpa [#allocation3], 0  ;;  %s253_s0 = inlined_call_operand.hbm [shape: f32[16,128], index: 0, kind: input, shape index: {}]   ;;  %s254_s1 = inlined_call_operand.hbm [shape: f32[16,128], index: 1, kind: input, shape index: {}]   ;;  %s255_s2 = inlined_call_operand.hbm [shape: f32[1,8,128], index: 2, kind: output, shape index: {}]  }
   0x1   :  { %8 = vsyncpa [#allocation6], 0 }
   0x2   :  { %9 = vsyncpa [#allocation4], 0  ;;  %s224_s9 = smov [#allocation2]  }
   0x3   :  { %s15_s10 = sshll.u32 %s224_s9, 4  ;;  %s16_s10 = int_to_ptr.vmem [resolvable:$true] %s15_s10 }
   0x4   :  { %s166_s11 = scalar_lea.vmem %s16_s10, 256  ;;  %p171_p1 = scmp.lt.s32.totalorder %s16_s10, %s16_s10 }
   0x5   :  { %p167_p0 = scmp.ne.s32.totalorder %s16_s10, %s166_s11  ;;  %p172_p2 = scmp.lt.s32.totalorder %s166_s11, %s166_s11 }
   0x7   :  { %p173_p3 = por %p172_p2, %p171_p1 }
   0x9   :  { %p174_p4 = pnand %p173_p3, %p167_p0 }
   0xb   :  { %177 = shalt.err (!%p174_p4)
}
   0xc   :  { %s225_s12 = smov 128   ;;  %s226_s13 = smov 8  }
   0xd   :  { %21 = dma.hbm_to_vmem [thread:$0]  %s253_s0, 256, %s16_s10, [#allocation3], %s225_s12, %s225_s12, %s226_s13  }
   0xe   :  { %s227_s16 = smov [#allocation5]  }
   0xf   :  { %s27_s17 = sshll.u32 %s227_s16, 4  ;;  %s28_s17 = int_to_ptr.vmem [resolvable:$true] %s27_s17 }
  0x10   :  { %s186_s18 = scalar_lea.vmem %s28_s17, 256  ;;  %p191_p6 = scmp.lt.s32.totalorder %s28_s17, %s28_s17 }
  0x11   :  { %p187_p5 = scmp.ne.s32.totalorder %s28_s17, %s186_s18  ;;  %p192_p7 = scmp.lt.s32.totalorder %s186_s18, %s186_s18 }
  0x13   :  { %p193_p8 = por %p192_p7, %p191_p6 }
  0x15   :  { %p194_p9 = pnand %p193_p8, %p187_p5 }
  0x17   :  { %197 = shalt.err (!%p194_p9)
}
  0x18   :  { %33 = dma.hbm_to_vmem [thread:$0]  %s254_s1, 256, %s28_s17, [#allocation6], %s225_s12, %s225_s12, %s226_s13  }
  0x19   :  { %218 = dma.done.wait [#allocation3], 256  }
  0x1a   :  { %219 = vsyncadd [#allocation3], 4294967040 }
  0x1b   :  { %220 = dma.done.wait [#allocation6], 256  }
  0x1c   :  { %221 = vsyncadd [#allocation6], 4294967040  ;;  %v40_v0 = vld [vmem:[#allocation2] sm:$0xff]  ;;  %v41_v1 = vld [vmem:[#allocation2 + $0x8] sm:$0xff]  ;;  %v100_v25 = vlaneseq  ;;  %s228_s0 = smov [#allocation7]  }
  0x1d   :  { %v135_v2 = vmul.f32 -1.442695, %v40_v0  ;;  %v136_v3 = vmul.f32 -1.442695, %v41_v1  ;;  %v42_v17 = vld [vmem:[#allocation5] sm:$0xff]  ;;  %v43_v19 = vld [vmem:[#allocation5 + $0x8] sm:$0xff] }
  0x1e   :  { %v101_v29 = vshrl.u32 %v100_v25, 7  ;;  %v104_v39 = vand.u32 127, %v100_v25  ;;  %v62_v41 = vsub.f32 1.0, %v42_v17  ;;  %v63_v44 = vsub.f32 1.0, %v43_v19  ;;  %s125_s1 = sshll.u32 %s228_s0, 4  ;;  %s126_s1 = int_to_ptr.vmem [resolvable:$true] %s125_s1 }
  0x1f   :  { %142 = vpow2.f32 %v135_v2  ;;  %vm92_vm0 = vcmp.gt.f32.partialorder %v42_v17, 0.5  ;;  %vm93_vm1 = vcmp.gt.f32.partialorder %v43_v19, 0.5  ;;  %s198_s21 = scalar_lea.vmem %s126_s1, 128  ;;  %p203_p11 = scmp.lt.s32.totalorder %s126_s1, %s126_s1 }
  0x20   :  { %144 = vpow2.f32 %v136_v3  ;;  %v102_v34 = vadd.s32 8, %v101_v29  ;;  %v109_v40 = vmul.u32 128, %v101_v29  ;;  %p199_p10 = scmp.ne.s32.totalorder %s126_s1, %s198_s21  ;;  %p204_p12 = scmp.lt.s32.totalorder %s198_s21, %s198_s21 }
  0x22   :  { %v110_v42 = vmul.u32 128, %v102_v34  ;;  %v111_v52 = vadd.s32 %v109_v40, %v104_v39  ;;  %p205_p13 = por %p204_p12, %p203_p11 }
  0x24   :  { %v112_v54 = vadd.s32 %v110_v42, %v104_v39  ;;  %vm113_vm2 = vcmp.lt.s32.totalorder %v111_v52, 2048  ;;  %p206_p0 = pnand %p205_p13, %p199_p10 }
  0x26   :  { %vm114_vm3 = vcmp.lt.s32.totalorder %v112_v54, 2048 }
  0x2c   :  { %v143_v4 = vpop.eup %142 }
  0x2d   :  { %v145_v5 = vpop.eup %144  ;;  %v50_v6 = vadd.f32 1.0, %v143_v4 }
  0x2e   :  { %v51_v7 = vadd.f32 1.0, %v145_v5 }
  0x2f   :  { %146 = vrcp.f32 %v50_v6 }
  0x30   :  { %148 = vrcp.f32 %v51_v7 }
  0x3c   :  { %v147_v8 = vpop.eup %146 }
  0x3d   :  { %v149_v9 = vpop.eup %148  ;;  %v56_v10 = vsub.f32 1.0, %v147_v8  ;;  %v64_v11 = vmax.f32 %v147_v8, 1e-08 }
  0x3e   :  { %v57_v12 = vsub.f32 1.0, %v149_v9  ;;  %v65_v13 = vmax.f32 %v149_v9, 1e-08 }
  0x3f   :  { %v58_v14 = vadd.f32 0.05, %v56_v10  ;;  %150 = vlog2.f32 %v64_v11 }
  0x40   :  { %v59_v15 = vadd.f32 0.05, %v57_v12  ;;  %152 = vlog2.f32 %v65_v13 }
  0x41   :  { %v60_v16 = vmin.f32 %v58_v14, 1.0 }
  0x42   :  { %v61_v18 = vmin.f32 %v59_v15, 1.0 }
  0x43   :  { %v72_v20 = vmax.f32 %v60_v16, 1e-08  ;;  %v82_v21 = vsub.f32 %v147_v8, %v60_v16 }
  0x44   :  { %v73_v22 = vmax.f32 %v61_v18, 1e-08  ;;  %v83_v23 = vsub.f32 %v149_v9, %v61_v18 }
  0x45   :  { %154 = vlog2.f32 %v72_v20  ;;  %v84_v24 = vmul.f32 %v82_v21, %v42_v17 }
  0x46   :  { %156 = vlog2.f32 %v73_v22  ;;  %v85_v26 = vmul.f32 %v83_v23, %v43_v19 }
  0x47   :  { %v86_v27 = vadd.f32 %v84_v24, %v60_v16 }
  0x48   :  { %v87_v28 = vadd.f32 %v85_v26, %v61_v18 }
  0x49   :  { %v88_v30 = vsub.f32 1.0, %v86_v27 }
  0x4a   :  { %v89_v31 = vsub.f32 1.0, %v87_v28 }
  0x4b   :  { %v90_v35 = vmul.f32 %v88_v30, %v88_v30 }
  0x4c   :  { %v151_v32 = vpop.eup %150  ;;  %v91_v37 = vmul.f32 %v89_v31, %v89_v31 }
  0x4d   :  { %v153_v33 = vpop.eup %152  ;;  %v67_v36 = vmul.f32 0.6931472, %v151_v32  ;;  %v94_v45 = vmul.f32 %v90_v35, %v90_v35 }
  0x4e   :  { %v69_v38 = vmul.f32 0.6931472, %v153_v33  ;;  %v95_v49 = vmul.f32 %v91_v37, %v91_v37 }
  0x4f   :  { %v70_v47 = vmul.f32 %v67_v36, %v42_v17  ;;  %v96_v56 = vsel %vm92_vm0, %v88_v30, %v94_v45 }
  0x50   :  { %v71_v50 = vmul.f32 %v69_v38, %v43_v19  ;;  %v97_v58 = vsel %vm93_vm1, %v89_v31, %v95_v49 }
  0x52   :  { %v155_v43 = vpop.eup %154 }
  0x53   :  { %v157_v46 = vpop.eup %156  ;;  %v75_v48 = vmul.f32 0.6931472, %v155_v43 }
  0x54   :  { %v77_v51 = vmul.f32 0.6931472, %v157_v46 }
  0x55   :  { %v78_v53 = vmul.f32 %v75_v48, %v62_v41 }
  0x56   :  { %v79_v55 = vmul.f32 %v77_v51, %v63_v44 }
  0x57   :  { %v80_v57 = vadd.f32 %v78_v53, %v70_v47 }
  0x58   :  { %v81_v59 = vadd.f32 %v79_v55, %v71_v50 }
  0x59   :  { %v98_v60 = vmul.f32 %v96_v56, %v80_v57 }
  0x5a   :  { %v99_v61 = vmul.f32 %v97_v58, %v81_v59 }
  0x5b   :  { %v115_v62 = vsel %vm113_vm2, %v98_v60, 0.0 }
  0x5c   :  { %v116_v63 = vsel %vm114_vm3, %v99_v61, 0.0 }
  0x5d   :  { %v117_v0 = vadd.f32 %v116_v63, %v115_v62 }
  0x5f   :  { %118 = vst [vmem:[#allocation7] sm:$0xff] %v117_v0 }
  0x60   :  { %209 = shalt.err (!%p206_p0)
}
  0x61   :  { %128 = dma.vmem_to_hbm [thread:$0]  %s126_s1, 128, %s255_s2, [#allocation4]  }
  0x62   :  { %222 = dma.done.wait [#allocation4], 128  }
  0x63   :  { %223 = vsyncadd [#allocation4], 4294967168 }
  0x64   :  { %132 = vsyncpa [#allocation3], 1 }
  0x65   :  { %133 = vsyncpa [#allocation6], 1 }
  0x66   :  { %134 = vsyncpa [#allocation4], 1 }

</bundles_post_ra>
